<compile_context>
chip_gen: v7x
topology: tpu7x:2x2x1
jax: 0.10.0
libtpu: 0.0.40
codegen_flags: <defaults>
</compile_context>

<pallas_src>
import functools

import jax
import jax.numpy as jnp
from jax.experimental import pallas as pl
from jax.experimental.pallas import tpu as pltpu


def _round_up(x: int, m: int) -> int:
    return (x + m - 1) // m * m


def _label_smoothing_kernel(x_ref, tgt_ref, out_ref, row_acc_ref, *,
                            smoothing: float, n_total: int, block_rows: int,
                            blocks_per_core: int):
    i = pl.program_id(1)

    @pl.when(i == 0)
    def _init():
        row_acc_ref[...] = jnp.zeros_like(row_acc_ref)

    x = x_ref[...].astype(jnp.float32)            # (TN, C), cast per-tile in VMEM
    tgt = tgt_ref[...]                            # (TN, 1) int32
    tn, c = x.shape

    # Global (unclamped) row ids: rows past the batch end -- including the
    # duplicated clamp-steps of the last core -- get masked out of the loss.
    block_idx = pl.program_id(0) * blocks_per_core + i
    row_id = block_idx * block_rows + jax.lax.broadcasted_iota(jnp.int32, (tn, 1), 0)
    valid = row_id < n_total                      # (TN, 1) bool

    # Row-wise logsumexp.  No full-tile mask on x: padded-row garbage only
    # affects those rows and is dropped by the row-level select below.
    m = jnp.max(x, axis=-1, keepdims=True)
    lse = m + jnp.log(jnp.sum(jnp.exp(x - m), axis=-1, keepdims=True))

    # Fused target-gather + mean: per-row loss = lse - sum_j w_j * x_j with
    #   w_j = smoothing/C          (all classes)
    #       + confidence           (target class)
    # which equals confidence*nll + smoothing*smooth of the reference module.
    confidence = 1.0 - smoothing
    base_w = smoothing / c
    class_ids = jax.lax.broadcasted_iota(jnp.int32, (tn, c), 1)
    w = jnp.where(class_ids == tgt, confidence + base_w, base_w)
    weighted = jnp.sum(w * x, axis=-1, keepdims=True)           # (TN, 1)

    # Pure VPU add into the per-core per-row accumulator each step.
    row_acc_ref[...] += jnp.where(valid, lse - weighted, 0.0)

    @pl.when(i == pl.num_programs(1) - 1)
    def _finalize():
        # Single cross-sublane reduce at the end; 1/N folded at trace time.
        out_ref[...] = jnp.sum(row_acc_ref[...], keepdims=True) * (1.0 / n_total)


def label_smoothing_loss(x: jax.Array, target: jax.Array,
                         smoothing: float = 0.1,
                         block_rows: int | None = None) -> jax.Array:
    """x: (N, C) logits (any float dtype); target: (N,) int labels. Scalar loss."""
    n, c = x.shape
    tgt2d = target.astype(jnp.int32).reshape(n, 1)

    itemsize = jnp.dtype(x.dtype).itemsize
    sub = max(8, 32 // itemsize)          # native sublane tile: 8 f32 / 16 bf16 / 32 i8

    if block_rows is None:
        # Per-row VMEM bytes: x tile double-buffered in its native dtype,
        # ~3x f32 cast/working copies, lane-padded (rows,1) int32 target
        # (double-buffered) and the (rows,1) f32 accumulator scratch.
        per_row_bytes = (2 * c * itemsize
                         + 3 * c * 4
                         + 2 * 128 * 4
                         + 128 * 4)
        vmem_budget = 24 * 1024 * 1024    # per-core; safe on v7x (64 MiB/TC)
        block_rows = max(sub, min(vmem_budget // per_row_bytes, 4096,
                                  _round_up(n, sub)))
    block_rows = max(sub, _round_up(int(block_rows), sub))
    # TODO(synk): if a single row of x (~4*C bytes in f32) no longer fits the
    # VMEM budget (huge C), the class dim would need tiling too.

    total_blocks = pl.cdiv(n, block_rows)
    # Split the batch over the 2 TensorCores on v7x (no-op cost on 1-TC chips).
    num_core_splits = 2 if total_blocks >= 2 else 1
    blocks_per_core = pl.cdiv(total_blocks, num_core_splits)

    def row_block_map(cc, ii):
        # Clamp so overhang steps of the last core never DMA out of bounds;
        # their rows are masked in-kernel via the global row-id check.
        return (jnp.minimum(cc * blocks_per_core + ii, total_blocks - 1), 0)

    kernel = functools.partial(_label_smoothing_kernel,
                               smoothing=float(smoothing),
                               n_total=n,
                               block_rows=block_rows,
                               blocks_per_core=blocks_per_core)

    out = pl.pallas_call(
        kernel,
        out_shape=jax.ShapeDtypeStruct((num_core_splits, 1), jnp.float32),
        grid_spec=pltpu.PrefetchScalarGridSpec(
            num_scalar_prefetch=0,
            grid=(num_core_splits, blocks_per_core),
            in_specs=[
                pl.BlockSpec((block_rows, c), row_block_map),   # x (native dtype)
                pl.BlockSpec((block_rows, 1), row_block_map),   # int32 labels
            ],
            out_specs=pl.BlockSpec((1, 1), lambda cc, ii: (cc, 0)),
            scratch_shapes=[pltpu.VMEM((block_rows, 1), jnp.float32)],
        ),
        compiler_params=pltpu.CompilerParams(
            dimension_semantics=("parallel", "arbitrary"),
            vmem_limit_bytes=40 * 1024 * 1024),
    )(x, tgt2d)
    # Sum the per-core partials (each already divided by the global N).
    return jnp.sum(out)


def _reference(x, target, smoothing):
    logprobs = jax.nn.log_softmax(x.astype(jnp.float32), axis=-1)
    nll = -jnp.take_along_axis(logprobs, target[:, None], axis=-1)[:, 0]
    smooth = -jnp.mean(logprobs, axis=-1)
    loss = (1.0 - smoothing) * nll + smoothing * smooth
    return jnp.mean(loss)


if __name__ == "__main__":
    key = jax.random.PRNGKey(0)
    kx, kt, kx2, kt2 = jax.random.split(key, 4)
    smoothing = 0.1

    # Test 1: small shapes consistent with the module (batch of logits).
    N, C = 8, 32
    x = jax.random.normal(kx, (N, C), dtype=jnp.float32)
    target = jax.random.randint(kt, (N,), 0, C, dtype=jnp.int32)
    loss = jax.block_until_ready(label_smoothing_loss(x, target, smoothing))
    ref = _reference(x, target, smoothing)
    assert jnp.allclose(loss, ref, atol=1e-5, rtol=1e-5), (loss, ref)

    # Test 2: non-aligned N and C, bf16 input, 2-core split with a partial
    # last tile plus clamped overhang steps (exercises masking + in-kernel cast).
    N2, C2 = 37, 100
    x2 = jax.random.normal(kx2, (N2, C2), dtype=jnp.float32).astype(jnp.bfloat16)
    t2 = jax.random.randint(kt2, (N2,), 0, C2, dtype=jnp.int32)
    loss2 = jax.block_until_ready(
        label_smoothing_loss(x2, t2, smoothing, block_rows=16))
    ref2 = _reference(x2, t2, smoothing)
    assert jnp.allclose(loss2, ref2, atol=1e-4, rtol=1e-4), (loss2, ref2)

    print("KERNEL_OK")
</pallas_src>

<mosaic_0001>
module attributes {stable_mosaic.version = 11 : i64} {
  func.func @_label_smoothing_kernel(%arg0: i32, %arg1: i32, %arg2: memref<8x32xf32, #tpu.memory_space<vmem>>, %arg3: memref<8x1xi32, #tpu.memory_space<vmem>>, %arg4: memref<1x1xf32, #tpu.memory_space<vmem>>, %arg5: memref<8x1xf32, #tpu.memory_space<vmem>>) attributes {dimension_semantics = [#tpu.dimension_semantics<parallel>, #tpu.dimension_semantics<arbitrary>], iteration_bounds = array<i64: 1, 1>, scalar_prefetch = 0 : i64, scratch_operands = 1 : i64, tpu.core_type = #tpu.core_type<tc>, window_params = [{transform_indices = @transform_0, window_bounds = array<i64: 8, 32>}, {transform_indices = @transform_1, window_bounds = array<i64: 8, 1>}, {transform_indices = @transform_2, window_bounds = array<i64: 1, 1>}]} {
    %c0_i32 = arith.constant 0 : i32
    %0 = arith.cmpi eq, %arg1, %c0_i32 : i32
    %1 = arith.extui %0 : i1 to i32
    %c0_i32_0 = arith.constant 0 : i32
    %2 = arith.cmpi ne, %1, %c0_i32_0 : i32
    scf.if %2 {
      %cst_16 = arith.constant 0.000000e+00 : f32
      %40 = vector.broadcast %cst_16 : f32 to vector<8x1xf32>
      %c0_17 = arith.constant 0 : index
      %c0_18 = arith.constant 0 : index
      %41 = vector.load %arg5[%c0_17, %c0_18] : memref<8x1xf32, #tpu.memory_space<vmem>>, vector<8x1xf32>
      tpu.vector_store %arg5[%c0_17, %c0_18], %40 {strides = array<i32>} : memref<8x1xf32, #tpu.memory_space<vmem>>, vector<8x1xf32>,
    } else {
    }
    %c0 = arith.constant 0 : index
    %c0_1 = arith.constant 0 : index
    %3 = vector.load %arg2[%c0, %c0_1] : memref<8x32xf32, #tpu.memory_space<vmem>>, vector<8x32xf32>
    %c0_2 = arith.constant 0 : index
    %c0_3 = arith.constant 0 : index
    %4 = vector.load %arg3[%c0_2, %c0_3] : memref<8x1xi32, #tpu.memory_space<vmem>>, vector<8x1xi32>
    %c1_i32 = arith.constant 1 : i32
    %5 = arith.muli %arg0, %c1_i32 : i32
    %6 = arith.addi %5, %arg1 : i32
    %c8_i32 = arith.constant 8 : i32
    %7 = arith.muli %6, %c8_i32 : i32
    %8 = tpu.iota {dimensions = array<i32: 0>} : vector<8x1xi32>
    %9 = vector.broadcast %7 : i32 to vector<8x1xi32>
    %10 = arith.addi %9, %8 : vector<8x1xi32>
    %c8_i32_4 = arith.constant 8 : i32
    %11 = vector.broadcast %c8_i32_4 : i32 to vector<8x1xi32>
    %12 = arith.cmpi slt, %10, %11 : vector<8x1xi32>
    %cst = arith.constant dense<0xFF800000> : vector<8xf32>
    %13 = vector.multi_reduction <maximumf>, %3, %cst [1] : vector<8x32xf32> to vector<8xf32>
    %14 = vector.shape_cast %13 : vector<8xf32> to vector<8x1xf32>
    %15 = vector.broadcast %14 : vector<8x1xf32> to vector<8x32xf32>
    %16 = arith.subf %3, %15 : vector<8x32xf32>
    %17 = math.exp %16 : vector<8x32xf32>
    %cst_5 = arith.constant dense<0.000000e+00> : vector<8xf32>
    %18 = vector.multi_reduction <add>, %17, %cst_5 [1] : vector<8x32xf32> to vector<8xf32>
    %19 = vector.shape_cast %18 : vector<8xf32> to vector<8x1xf32>
    %20 = math.log %19 : vector<8x1xf32>
    %21 = arith.addf %14, %20 : vector<8x1xf32>
    %22 = tpu.iota {dimensions = array<i32: 1>} : vector<8x32xi32>
    %23 = vector.broadcast %4 : vector<8x1xi32> to vector<8x32xi32>
    %24 = arith.cmpi eq, %22, %23 : vector<8x32xi32>
    %cst_6 = arith.constant 0.903124988 : f32
    %cst_7 = arith.constant 3.125000e-03 : f32
    %25 = vector.broadcast %cst_6 : f32 to vector<8x32xf32>
    %26 = vector.broadcast %cst_7 : f32 to vector<8x32xf32>
    %27 = arith.select %24, %25, %26 : vector<8x32xi1>, vector<8x32xf32>
    %28 = arith.mulf %27, %3 : vector<8x32xf32>
    %cst_8 = arith.constant dense<0.000000e+00> : vector<8xf32>
    %29 = vector.multi_reduction <add>, %28, %cst_8 [1] : vector<8x32xf32> to vector<8xf32>
    %30 = vector.shape_cast %29 : vector<8xf32> to vector<8x1xf32>
    %c0_9 = arith.constant 0 : index
    %c0_10 = arith.constant 0 : index
    %31 = vector.load %arg5[%c0_9, %c0_10] : memref<8x1xf32, #tpu.memory_space<vmem>>, vector<8x1xf32>
    %32 = arith.subf %21, %30 : vector<8x1xf32>
    %cst_11 = arith.constant 0.000000e+00 : f32
    %33 = vector.broadcast %cst_11 : f32 to vector<8x1xf32>
    %34 = arith.select %12, %32, %33 : vector<8x1xi1>, vector<8x1xf32>
    %35 = arith.addf %31, %34 : vector<8x1xf32>
    %c0_12 = arith.constant 0 : index
    %c0_13 = arith.constant 0 : index
    %36 = vector.load %arg5[%c0_12, %c0_13] : memref<8x1xf32, #tpu.memory_space<vmem>>, vector<8x1xf32>
    tpu.vector_store %arg5[%c0_12, %c0_13], %35 {strides = array<i32>} : memref<8x1xf32, #tpu.memory_space<vmem>>, vector<8x1xf32>,
    %c0_i32_14 = arith.constant 0 : i32
    %37 = arith.cmpi eq, %arg1, %c0_i32_14 : i32
    %38 = arith.extui %37 : i1 to i32
    %c0_i32_15 = arith.constant 0 : i32
    %39 = arith.cmpi ne, %38, %c0_i32_15 : i32
    scf.if %39 {
      %c0_16 = arith.constant 0 : index
      %c0_17 = arith.constant 0 : index
      %40 = vector.load %arg5[%c0_16, %c0_17] : memref<8x1xf32, #tpu.memory_space<vmem>>, vector<8x1xf32>
      %41 = vector.shape_cast %40 : vector<8x1xf32> to vector<1x8x1xf32>
      %cst_18 = arith.constant dense<0.000000e+00> : vector<1xf32>
      %42 = vector.multi_reduction <add>, %41, %cst_18 [1, 2] : vector<1x8x1xf32> to vector<1xf32>
      %43 = vector.shape_cast %42 : vector<1xf32> to vector<1x1x1xf32>
      %44 = vector.extract %43[0, 0, 0] : f32 from vector<1x1x1xf32>
      %45 = vector.broadcast %44 : f32 to vector<1x1xf32>
      %cst_19 = arith.constant 1.250000e-01 : f32
      %46 = vector.broadcast %cst_19 : f32 to vector<1x1xf32>
      %47 = arith.mulf %45, %46 : vector<1x1xf32>
      %c0_20 = arith.constant 0 : index
      %c0_21 = arith.constant 0 : index
      %48 = vector.load %arg4[%c0_20, %c0_21] : memref<1x1xf32, #tpu.memory_space<vmem>>, vector<1x1xf32>
      tpu.vector_store %arg4[%c0_20, %c0_21], %47 {strides = array<i32>} : memref<1x1xf32, #tpu.memory_space<vmem>>, vector<1x1xf32>,
    } else {
    }
    return
  }
  func.func @transform_0(%arg0: i32, %arg1: i32) -> (i32, i32) {
    %c1_i32 = arith.constant 1 : i32
    %0 = arith.muli %arg0, %c1_i32 : i32
    %1 = arith.addi %0, %arg1 : i32
    %c0_i32 = arith.constant 0 : i32
    %2 = arith.minsi %1, %c0_i32 : i32
    %c0_i32_0 = arith.constant 0 : i32
    %c0_i32_1 = arith.constant 0 : i32
    return %2, %c0_i32_0 : i32, i32
  }
  func.func @transform_1(%arg0: i32, %arg1: i32) -> (i32, i32) {
    %c1_i32 = arith.constant 1 : i32
    %0 = arith.muli %arg0, %c1_i32 : i32
    %1 = arith.addi %0, %arg1 : i32
    %c0_i32 = arith.constant 0 : i32
    %2 = arith.minsi %1, %c0_i32 : i32
    %c0_i32_0 = arith.constant 0 : i32
    %c0_i32_1 = arith.constant 0 : i32
    return %2, %c0_i32_0 : i32, i32
  }
  func.func @transform_2(%arg0: i32, %arg1: i32) -> (i32, i32) {
    %c0_i32 = arith.constant 0 : i32
    %c0_i32_0 = arith.constant 0 : i32
    return %arg0, %c0_i32 : i32, i32
  }
}

</mosaic_0001>

<bundles_post_ra>
// kernel: tpu_custom_call.1
= control target key start
LH: loop header
LB: loop body
LE: loop exit
PB: predicated region body
PF: predicated region fallthrough
CT: control target
= control target key end

     0   :  { %vm81_vm0 = vcmask 261120   ;;  %s230_s0 = inlined_call_operand.vmem [shape: f32[8,32], index: 0, kind: input, shape index: {}]   ;;  %s231_s1 = inlined_call_operand.vmem [shape: s32[8,1], index: 1, kind: input, shape index: {}]   ;;  %s232_s2 = inlined_call_operand.hbm [shape: f32[1,1], index: 2, kind: output, shape index: {}]  }
   0x1   :  { %v72_v0 = vld [vmem:[%s230_s0] sm:$0xff] }
   0x2   :  { %7 = vsyncpa [#allocation4], 0  ;;  %v82_v1 = vsel %vm81_vm0, %v72_v0, -inf  ;;  %v190_v2 = vmov 0   ;;  %v73_v3 = vld [vmem:[%s231_s1] sm:$0xff]  ;;  %v94_v6 = vlaneseq  ;;  %vm70_vm2 = vcmask 7168  }
   0x3   :  { %161 = vset.pattern.permute.xlu0 %v190_v2  ;;  %v191_v10 = vmov 0.003125   ;;  %v192_v16 = vmov 0.0   ;;  %s193_s0 = smov [#allocation3]   ;;  %vm127_vm3 = vcmask 0  }
   0x4   :  { %83 = vmax.xlane.f32.xlu0 %v82_v1  ;;  %v95_v8 = vand.u32 127, %v94_v6  ;;  %71 = vst.msk [vmem:[#allocation2] sm:$0xff] %vm70_vm2, %v192_v16  ;;  %s135_s1 = sshll.u32 %s193_s0, 4  ;;  %s136_s1 = int_to_ptr.vmem [resolvable:$true] %s135_s1 }
   0x5   :  { %s166_s14 = scalar_lea.vmem %s136_s1, 16  ;;  %s170_s15 = scalar_lea.vmem %s136_s1, 32 }
   0x6   :  { %p167_p0 = scmp.ne.s32.totalorder %s136_s1, %s166_s14  ;;  %p171_p1 = scmp.lt.s32.totalorder %s136_s1, %s136_s1 }
   0x7   :  { %p172_p2 = scmp.lt.s32.totalorder %s170_s15, %s166_s14 }
   0x9   :  { %p173_p3 = por %p172_p2, %p171_p1 }
   0xb   :  { %v105_v22 = vld [vmem:[#allocation2] sm:$0xff]  ;;  %p174_p4 = pnand %p173_p3, %p167_p0 }
  0x1a   :  { %97 = vperm.xlu0 %161, %v73_v3  }
  0x91   :  { %v84_v4 = vpop.xlane.xlu0 %83 }
  0x92   :  { %v85_v5 = vsub.f32 %v72_v0, %v84_v4 }
  0x94   :  { %v86_v7 = vmul.f32 1.442695, %v85_v5 }
  0x96   :  { %162 = vpow2.f32 %v86_v7 }
  0x99   :  { %v98_v9 = vpop.permute.xlu0 %97 }
  0x9a   :  { %vm99_vm1 = vcmp.eq.s32.totalorder %v95_v8, %v98_v9 }
  0x9b   :  { %v100_v11 = vsel %vm99_vm1, 0.903125, %v191_v10 }
  0x9c   :  { %v101_v12 = vmul.f32 %v100_v11, %v72_v0 }
  0x9e   :  { %v102_v15 = vsel %vm81_vm0, %v101_v12, 0.0 }
  0xa0   :  { %v163_v13 = vpop.eup %162 }
  0xa1   :  { %v88_v14 = vsel %vm81_vm0, %v163_v13, 0.0 }
  0xa2   :  { %89 = vadd.xlane.f32.xlu1 %v88_v14 }
  0xa6   :  { %103 = vadd.xlane.f32.xlu1 %v102_v15 }
 0x12f   :  { %v90_v17 = vpop.xlane.xlu1 %89 }
 0x130   :  { %164 = vlog2.f32 %v90_v17 }
 0x133   :  { %v104_v20 = vpop.xlane.xlu1 %103 }
 0x13a   :  { %v165_v18 = vpop.eup %164 }
 0x13b   :  { %v92_v19 = vmul.f32 0.6931472, %v165_v18 }
 0x13d   :  { %v93_v21 = vadd.f32 %v92_v19, %v84_v4 }
 0x13f   :  { %v106_v23 = vsub.f32 %v93_v21, %v104_v20 }
 0x141   :  { %v108_v24 = vadd.f32 %v106_v23, %v105_v22 }
 0x143   :  { %110 = vst.msk [vmem:[#allocation2] sm:$0xff] %vm70_vm2, %v108_v24 }
 0x14a   :  { %v114_v25 = vld [vmem:[#allocation2] sm:$0xff] }
 0x14b   :  { %v115_v26 = vsel %vm70_vm2, %v114_v25, 0.0 }
 0x14c   :  { %116 = vadd.xlane.f32.xlu1 %v115_v26 }
 0x1d9   :  { %v117_v27 = vpop.xlane.xlu1 %116 }
 0x1da   :  { %v118_v28 = vrot.slane %v117_v27, 4 }
 0x1dc   :  { %v119_v29 = vadd.f32 %v118_v28, %v117_v27 }
 0x1de   :  { %v120_v30 = vrot.slane %v119_v29, 2 }
 0x1e0   :  { %v121_v31 = vadd.f32 %v120_v30, %v119_v29 }
 0x1e2   :  { %v122_v32 = vrot.slane %v121_v31, 1 }
 0x1e4   :  { %v123_v33 = vadd.f32 %v122_v32, %v121_v31 }
 0x1e6   :  { %155 = vpush %v123_v33 }
 0x217   :  { %s156_s13 = spop %155 }
 0x218   :  { %v125_v34 = vstv %s156_s13 }
 0x219   :  { %v126_v35 = vmul.f32 0.125, %v125_v34 }
 0x21b   :  { %128 = vst.msk [vmem:[#allocation3] sm:$0x1] %vm127_vm3, %v126_v35 }
 0x21c   :  { %177 = shalt.err (!%p174_p4)
}
 0x21d   :  { %s178_s18 = scalar_lea.hbm %s232_s2, 16 }
 0x21e   :  { %p179_p5 = scmp.ne.s32.totalorder %s232_s2, %s178_s18  ;;  %p182_p6 = scmp.lt.u32.totalorder %s178_s18, %s232_s2 }
 0x220   :  { %p184_p7 = pnand %p182_p6, %p179_p5 }
 0x222   :  { %187 = shalt.err (!%p184_p7)
}
 0x223   :  { %138 = dma.vmem_to_hbm [thread:$0]  %s136_s1, 16, %s232_s2, [#allocation4]  }
 0x224   :  { %188 = dma.done.wait [#allocation4], 16  }
 0x225   :  { %189 = vsyncadd [#allocation4], 4294967280 }
 0x226   :  { %142 = vsyncpa [#allocation4], 1 }

</bundles_post_ra>
